<compile_context>
chip_gen: v6e
topology: v6e:2x2x1
jax: 0.10.0
libtpu: 0.0.40
codegen_flags: <defaults>
</compile_context>

<pallas_src>
from functools import partial

import numpy as np
import jax
import jax.numpy as jnp
from jax.experimental import pallas as pl
from jax.experimental.pallas import tpu as pltpu

_SAT = 20.0  # tanh(_SAT) == 1.0 in f32; "ones lane" that carries b2a / b2c into the reduces


def gav_kernel(x_ref, noise_ref, w_ref, out_ref):
    """Fused actor+critic forward for one batch tile.

    x_ref    : (bb, in_dim)        VMEM  observations
    noise_ref: (bb, 1)             VMEM  per-sample exploration noise
    w_ref    : (in_dim+4, 2*HP)    VMEM  merged, lane-padded weight slab (see pack_params)
    out_ref  : (bb, 2)             VMEM  col0: q, col1: act
    """
    in_dim = x_ref.shape[1]
    HP = w_ref.shape[1] // 2                       # lane-padded half width (multiple of 128)

    # Layer 1 of actor AND critic(x-part): one MXU matmul; bias row added on the VPU.
    pre1 = jnp.dot(x_ref[...], w_ref[:in_dim, :],
                   preferred_element_type=jnp.float32)          # (bb, 2*HP)
    pre1 = pre1 + w_ref[in_dim:in_dim + 1, :]                   # + [b1a|SAT|0.. , b1c|SAT|0..]

    # ---- actor head: tanh -> VPU multiply + lane reduce (b2a rides on the SAT lane) + noise ----
    h_a = jnp.tanh(pre1[:, :HP])                                # vreg-aligned slice
    act = (jnp.sum(h_a * w_ref[in_dim + 2:in_dim + 3, :HP], axis=-1, keepdims=True)
           + noise_ref[...])                                    # (bb, 1)
    out_ref[:, 1:2] = act          # store act immediately; overlaps with the critic tail

    # ---- critic head: add act * w1c_act to the precomputed x-part, tanh, reduce (b2c on SAT) ----
    h_c = jnp.tanh(pre1[:, HP:] + act * w_ref[in_dim + 1:in_dim + 2, :HP])
    out_ref[:, 0:1] = jnp.sum(h_c * w_ref[in_dim + 3:in_dim + 4, :HP],
                              axis=-1, keepdims=True)           # q


def pack_params(params):
    """Host-side, ONCE per parameter set: pack all 10 tiny tensors into ONE lane-padded slab.

    Slab shape (in_dim+4, 2*HP), HP = 128*ceil((h+1)/128):
      rows [0,in_dim)  lanes [0,h)   : W1a            lanes [HP,HP+h) : W1c_x
      row  in_dim      lanes [0,h)=b1a, lane h=SAT ;  lanes [HP,HP+h)=b1c, lane HP+h=SAT
      row  in_dim+1    lanes [0,h)   : w1c_act   (critic layer-1 weight on act; lane h stays 0)
      row  in_dim+2    lanes [0,h)=w2a^T, lane h=b2a
      row  in_dim+3    lanes [0,h)=w2c^T, lane h=b2c
    Every other lane is zero, so padded lanes are numerically inert (tanh(0)*0 = 0); the SAT
    lanes give tanh(SAT) = 1, carrying b2a / b2c into the second-layer lane reduces.
    """
    in_dim, h = params["w1a"].shape
    HP = 128 * int(np.ceil((h + 1) / 128))
    W = np.zeros((in_dim + 4, 2 * HP), np.float32)
    W[:in_dim, :h] = np.asarray(params["w1a"])
    W[:in_dim, HP:HP + h] = np.asarray(params["w1cx"])
    W[in_dim, :h] = np.asarray(params["b1a"])[0]
    W[in_dim, h] = _SAT
    W[in_dim, HP:HP + h] = np.asarray(params["b1c"])[0]
    W[in_dim, HP + h] = _SAT
    W[in_dim + 1, :h] = np.asarray(params["w1ca"])[0]
    W[in_dim + 2, :h] = np.asarray(params["w2a"])[:, 0]
    W[in_dim + 2, h] = float(np.asarray(params["b2a"])[0, 0])
    W[in_dim + 3, :h] = np.asarray(params["w2c"])[:, 0]
    W[in_dim + 3, h] = float(np.asarray(params["b2c"])[0, 0])
    return jnp.asarray(W)


@partial(jax.jit, static_argnames=("block_b",))
def gav_forward(x, noise, w_slab, *, block_b=64):
    """x: (B, in_dim) f32, noise: (B, 1) f32 -> (q (B,1), act (B,1))."""
    B, in_dim = x.shape
    bb = B if B < block_b else block_b
    assert B % bb == 0 and (bb % 8 == 0 or bb == B), "batch should be a multiple of 8"
    rows, width = w_slab.shape
    out = pl.pallas_call(
        gav_kernel,
        out_shape=jax.ShapeDtypeStruct((B, 2), jnp.float32),
        grid_spec=pltpu.PrefetchScalarGridSpec(
            num_scalar_prefetch=0,
            grid=(B // bb,),
            in_specs=[
                pl.BlockSpec((bb, in_dim), lambda i: (i, 0)),    # x batch tile
                pl.BlockSpec((bb, 1), lambda i: (i, 0)),         # per-sample noise
                pl.BlockSpec((rows, width), lambda i: (0, 0)),   # weight slab (resident)
            ],
            out_specs=pl.BlockSpec((bb, 2), lambda i: (i, 0)),
        ),
        compiler_params=pltpu.CompilerParams(
            dimension_semantics=("parallel",)),  # v7x: shard the batch across both TensorCores
    )(x, noise, w_slab)
    # TODO(synk): for very large B a (2, B) lane-dense output layout would make the writeback
    #             unmasked; at these sizes the (B, 2) slab + two column stores is sufficient.
    return out[:, 0:1], out[:, 1:2]


def init_params(key, in_dim, h_dim):
    """Deterministic init mimicking nn.Linear's U(-1/sqrt(fan_in), 1/sqrt(fan_in))."""
    ks = jax.random.split(key, 8)

    def lin(kw, kb, fan_in, fan_out):
        bound = 1.0 / np.sqrt(fan_in)
        w = jax.random.uniform(kw, (fan_in, fan_out), jnp.float32, -bound, bound)
        b = jax.random.uniform(kb, (1, fan_out), jnp.float32, -bound, bound)
        return w, b

    # actor: Linear(in_dim, h) -> Tanh -> Linear(h, 1)
    w1a, b1a = lin(ks[0], ks[1], in_dim, h_dim)
    w2a, b2a = lin(ks[2], ks[3], h_dim, 1)
    # critic: Linear(in_dim + 1, h) -> Tanh -> Linear(h, 1)
    w1c, b1c = lin(ks[4], ks[5], in_dim + 1, h_dim)
    w2c, b2c = lin(ks[6], ks[7], h_dim, 1)

    return {
        "w1a": w1a, "b1a": b1a, "w2a": w2a, "b2a": b2a,
        "w1cx": w1c[:in_dim, :],            # (in_dim, h) — multiplies x
        "w1ca": w1c[in_dim:in_dim + 1, :],  # (1, h)      — multiplies act
        "b1c": b1c, "w2c": w2c, "b2c": b2c,
    }


def reference_forward(x, params, noise):
    """Pure-JAX reference (batched): identical math to the PyTorch module."""
    h_a = jnp.tanh(x @ params["w1a"] + params["b1a"])
    act = h_a @ params["w2a"] + params["b2a"] + noise
    x_aug = jnp.concatenate([x, act], axis=1)
    w1c = jnp.concatenate([params["w1cx"], params["w1ca"]], axis=0)
    h_c = jnp.tanh(x_aug @ w1c + params["b1c"])
    q = h_c @ params["w2c"] + params["b2c"]
    return q, act


if __name__ == "__main__":
    in_dim, h_dim = 8, 32
    batch = 128                    # amortizes fixed pallas_call + DMA cost; 2 grid blocks of 64
    gaussian_noise = 0.01

    key = jax.random.PRNGKey(0)
    k_params, k_x, k_noise = jax.random.split(key, 3)

    params = init_params(k_params, in_dim, h_dim)
    w_slab = pack_params(params)

    # B independent observations (each corresponds to one PyTorch forward call).
    x = jax.random.normal(k_x, (batch, in_dim), dtype=jnp.float32)
    # deterministic stand-in for per-call np.random.normal(0, gaussian_noise)
    noise = gaussian_noise * jax.random.normal(k_noise, (batch, 1), dtype=jnp.float32)

    q, act = gav_forward(x, noise, w_slab)
    jax.block_until_ready((q, act))

    q_ref, act_ref = reference_forward(x, params, noise)
    np.testing.assert_allclose(np.asarray(act), np.asarray(act_ref), rtol=1e-5, atol=1e-5)
    np.testing.assert_allclose(np.asarray(q), np.asarray(q_ref), rtol=1e-5, atol=1e-5)

    print("KERNEL_OK")
</pallas_src>

<mosaic_0001>
module attributes {stable_mosaic.version = 11 : i64} {
  func.func @gav_kernel(%arg0: i32, %arg1: memref<64x8xf32, #tpu.memory_space<vmem>>, %arg2: memref<64x1xf32, #tpu.memory_space<vmem>>, %arg3: memref<12x256xf32, #tpu.memory_space<vmem>>, %arg4: memref<64x2xf32, #tpu.memory_space<vmem>>) attributes {dimension_semantics = [#tpu.dimension_semantics<parallel>], iteration_bounds = array<i64: 2>, scalar_prefetch = 0 : i64, scratch_operands = 0 : i64, tpu.core_type = #tpu.core_type<tc>, window_params = [{transform_indices = @transform_0, window_bounds = array<i64: 64, 8>}, {transform_indices = @transform_1, window_bounds = array<i64: 64, 1>}, {pipeline_mode = #tpu.pipeline_mode<synchronous>, transform_indices = @transform_2, window_bounds = array<i64: 12, 256>}, {transform_indices = @transform_3, window_bounds = array<i64: 64, 2>}]} {
    %c0 = arith.constant 0 : index
    %c0_0 = arith.constant 0 : index
    %0 = vector.load %arg1[%c0, %c0_0] : memref<64x8xf32, #tpu.memory_space<vmem>>, vector<64x8xf32>
    %c0_1 = arith.constant 0 : index
    %c0_2 = arith.constant 0 : index
    %1 = vector.load %arg3[%c0_1, %c0_2] : memref<12x256xf32, #tpu.memory_space<vmem>>, vector<8x256xf32>
    %cst = arith.constant dense<0.000000e+00> : vector<64x256xf32>
    %2 = tpu.matmul %0, %1, %cst {dimension_numbers = #tpu.dot_dimension_numbers<[1], [0], [0], [1], [0, 0, 1, 1], [], []>} : vector<64x8xf32>, vector<8x256xf32>, vector<64x256xf32> -> vector<64x256xf32>
    %c8 = arith.constant 8 : index
    %c0_3 = arith.constant 0 : index
    %3 = vector.load %arg3[%c8, %c0_3] : memref<12x256xf32, #tpu.memory_space<vmem>>, vector<1x256xf32>
    %4 = vector.broadcast %3 : vector<1x256xf32> to vector<64x256xf32>
    %5 = arith.addf %2, %4 : vector<64x256xf32>
    %6 = vector.extract_strided_slice %5 {offsets = [0, 0], sizes = [64, 128], strides = [1, 1]} : vector<64x256xf32> to vector<64x128xf32>
    %7 = math.tanh %6 : vector<64x128xf32>
    %c10 = arith.constant 10 : index
    %c0_4 = arith.constant 0 : index
    %8 = vector.load %arg3[%c10, %c0_4] : memref<12x256xf32, #tpu.memory_space<vmem>>, vector<1x128xf32>
    %9 = vector.broadcast %8 : vector<1x128xf32> to vector<64x128xf32>
    %10 = arith.mulf %7, %9 : vector<64x128xf32>
    %cst_5 = arith.constant dense<0.000000e+00> : vector<64xf32>
    %11 = vector.multi_reduction <add>, %10, %cst_5 [1] : vector<64x128xf32> to vector<64xf32>
    %12 = vector.shape_cast %11 : vector<64xf32> to vector<64x1xf32>
    %c0_6 = arith.constant 0 : index
    %c0_7 = arith.constant 0 : index
    %13 = vector.load %arg2[%c0_6, %c0_7] : memref<64x1xf32, #tpu.memory_space<vmem>>, vector<64x1xf32>
    %14 = arith.addf %12, %13 : vector<64x1xf32>
    %c0_8 = arith.constant 0 : index
    %c1 = arith.constant 1 : index
    %15 = vector.load %arg4[%c0_8, %c1] : memref<64x2xf32, #tpu.memory_space<vmem>>, vector<64x1xf32>
    tpu.vector_store %arg4[%c0_8, %c1], %14 {strides = array<i32>} : memref<64x2xf32, #tpu.memory_space<vmem>>, vector<64x1xf32>,
    %16 = vector.extract_strided_slice %5 {offsets = [0, 128], sizes = [64, 128], strides = [1, 1]} : vector<64x256xf32> to vector<64x128xf32>
    %c9 = arith.constant 9 : index
    %c0_9 = arith.constant 0 : index
    %17 = vector.load %arg3[%c9, %c0_9] : memref<12x256xf32, #tpu.memory_space<vmem>>, vector<1x128xf32>
    %18 = vector.broadcast %14 : vector<64x1xf32> to vector<64x128xf32>
    %19 = vector.broadcast %17 : vector<1x128xf32> to vector<64x128xf32>
    %20 = arith.mulf %18, %19 : vector<64x128xf32>
    %21 = arith.addf %16, %20 : vector<64x128xf32>
    %22 = math.tanh %21 : vector<64x128xf32>
    %c11 = arith.constant 11 : index
    %c0_10 = arith.constant 0 : index
    %23 = vector.load %arg3[%c11, %c0_10] : memref<12x256xf32, #tpu.memory_space<vmem>>, vector<1x128xf32>
    %24 = vector.broadcast %23 : vector<1x128xf32> to vector<64x128xf32>
    %25 = arith.mulf %22, %24 : vector<64x128xf32>
    %cst_11 = arith.constant dense<0.000000e+00> : vector<64xf32>
    %26 = vector.multi_reduction <add>, %25, %cst_11 [1] : vector<64x128xf32> to vector<64xf32>
    %27 = vector.shape_cast %26 : vector<64xf32> to vector<64x1xf32>
    %c0_12 = arith.constant 0 : index
    %c0_13 = arith.constant 0 : index
    %28 = vector.load %arg4[%c0_12, %c0_13] : memref<64x2xf32, #tpu.memory_space<vmem>>, vector<64x1xf32>
    tpu.vector_store %arg4[%c0_12, %c0_13], %27 {strides = array<i32>} : memref<64x2xf32, #tpu.memory_space<vmem>>, vector<64x1xf32>,
    return
  }
  func.func @transform_0(%arg0: i32) -> (i32, i32) {
    %c0_i32 = arith.constant 0 : i32
    %c0_i32_0 = arith.constant 0 : i32
    return %arg0, %c0_i32 : i32, i32
  }
  func.func @transform_1(%arg0: i32) -> (i32, i32) {
    %c0_i32 = arith.constant 0 : i32
    %c0_i32_0 = arith.constant 0 : i32
    return %arg0, %c0_i32 : i32, i32
  }
  func.func @transform_2(%arg0: i32) -> (i32, i32) {
    %c0_i32 = arith.constant 0 : i32
    %c0_i32_0 = arith.constant 0 : i32
    %c0_i32_1 = arith.constant 0 : i32
    return %c0_i32, %c0_i32_0 : i32, i32
  }
  func.func @transform_3(%arg0: i32) -> (i32, i32) {
    %c0_i32 = arith.constant 0 : i32
    %c0_i32_0 = arith.constant 0 : i32
    return %arg0, %c0_i32 : i32, i32
  }
}

</mosaic_0001>

<bundles_post_ra>
// kernel: gav_forward.1
= control target key start
LH: loop header
LB: loop body
LE: loop exit
PB: predicated region body
PF: predicated region fallthrough
CT: control target
= control target key end

     0   :  { %s706_s12 = smov 0   ;;  %s843_s0 = inlined_call_operand.vmem [shape: f32[128,8], index: 0, kind: input, shape index: {}]   ;;  %s844_s1 = inlined_call_operand.vmem [shape: f32[128,1], index: 1, kind: input, shape index: {}]   ;;  %s845_s2 = inlined_call_operand.vmem [shape: f32[12,256], index: 2, kind: input, shape index: {}]   ;;  %s846_s3 = inlined_call_operand.vmem [shape: f32[128,2], index: 3, kind: output, shape index: {}]  }
   0x1 LB: > { %s606_s13 = sadd.s32 4294967295, %s681_s12   ;;  %p610_p0 = scmp.ge.s32.totalorder %s681_s12, 1  ;;  %s681_s12 = sphi %s706_s12, %s13_s12  }
   0x2   : > { %p149_p1 = scmp.lt.s32.totalorder %s681_s12, 3 }
   0x4   : > { %p150_p2 = pnand %p610_p0, %p149_p1 }
   0x5   : > { %s611_s18 = sshll.u32 (!%p150_p2), %s606_s13, 3  ;;  %s685_s30 = smov (!%p150_p2), 1  }
   0x6   : > { %153 = sbr.rel (%p150_p2) target bundleno = 682 (0x2aa), region = 32  ;;  %p179_p3 = scmp.lt.s32.totalorder (!%p150_p2), %s611_s18, 15 }
   0xb   : > { %v205_v0 = vld [vmem:[%s845_s2 + $0x8] sm:$0xff]  ;;  %v204_v1 = vld [vmem:[%s845_s2] sm:$0xff]  ;;  %v683_v2 = vmov 0.0   ;;  %s848_s18 = smov (!%p179_p3, %s611_s18), 15  ;;  %vm219_vm0 = vcmask 64512   ;;  %v209_v11 = vlaneseq  ;;  %v684_v54 = vmov 0  }
   0xc   : > { %274 = vmatprep.subr.mxu0 %v205_v0  ;;  %308 = vmatprep.mubr.f32.mxu0 %v683_v2  ;;  %s720_s19 = sshll.u32 %s848_s18, 3  ;;  %v740_v14 = vld [vmem:[%s845_s2 + $0x10] ss:$8 sm:$0x3]  ;;  %v365_v38 = vld [vmem:[%s845_s2 + $0x12] ss:$0 sm:$0xff] }
   0xd   : > { %275 = vmatpush1.msra.mxu0 %v204_v1  ;;  %628 = vmatprep.subr.mxu1 %v205_v0  ;;  %s182_s22 = scalar_lea.vmem %s843_s0, %s720_s19  ;;  %v734_v12 = vshrl.u32 %v209_v11, 7  ;;  %s762_s29 = scalar_lea.vmem %s844_s1, %s720_s19  ;;  %vm438_vm1 = vcmask 15368   ;;  %vm529_vm2 = vcmask 7168  }
   0xe   : > { %629 = vmatpush1.msra.mxu1 %v204_v1  ;;  %332 = vmatprep.mubr.f32.mxu1 %v683_v2  ;;  %v196_v3 = vld [vmem:[%s182_s22] sm:$0xff]  ;;  %v197_v5 = vld [vmem:[%s182_s22 + $0x8] sm:$0xff]  ;;  %v198_v7 = vld [vmem:[%s182_s22 + $0x10] sm:$0xff]  ;;  %s794_s8 = scalar_lea.vmem %s846_s3, %s720_s19 }
   0xf   : > { %v200_v4 = vld [vmem:[%s182_s22 + $0x20] sm:$0xff]  ;;  %618 = vmatmul.mubr.msk.f32.vlgmr.msra.gmra.mxu0 %vm219_vm0, %v196_v3  ;;  %v201_v6 = vld [vmem:[%s182_s22 + $0x28] sm:$0xff]  ;;  %v202_v8 = vld [vmem:[%s182_s22 + $0x30] sm:$0xff]  ;;  %v211_v13 = vsub.s32 0, %v734_v12  ;;  %641 = vset.pattern.permute.xlu0 %v684_v54 }
  0x10   : > { %622 = vmatmul.mubr.msk.f32.vlgmr.msra.gmra.mxu1 %vm219_vm0, %v200_v4  ;;  %314 = vmatprep.mubr.f32.mxu0 %v683_v2  ;;  %v199_v9 = vld [vmem:[%s182_s22 + $0x18] sm:$0xff]  ;;  %v390_v56 = vld [vmem:[%s762_s29] sm:$0xff]  ;;  %v395_v61 = vld [vmem:[%s762_s29 + $0x28] sm:$0xff] }
  0x11   : > { %338 = vmatprep.mubr.f32.mxu1 %v683_v2  ;;  %v203_v10 = vld [vmem:[%s182_s22 + $0x38] sm:$0xff]  ;;  %v212_v15 = vrot.slane %v740_v14, %v211_v13  ;;  %642 = vset.pattern.permute.xlu1 %v684_v54  ;;  %v394_v59 = vld [vmem:[%s762_s29 + $0x20] sm:$0xff]  ;;  %v391_v0 = vld [vmem:[%s762_s29 + $0x8] sm:$0xff] }
  0x13   : > { %619 = vmatmul.mubr.msk.f32.gmra.mxu0 %vm219_vm0, %v197_v5  ;;  %v393_v5 = vld [vmem:[%s762_s29 + $0x18] sm:$0xff] }
  0x14   : > { %623 = vmatmul.mubr.msk.f32.gmra.mxu1 %vm219_vm0, %v201_v6  ;;  %320 = vmatprep.mubr.f32.mxu0 %v683_v2  ;;  %v392_v6 = vld [vmem:[%s762_s29 + $0x10] sm:$0xff] }
  0x15   : > { %344 = vmatprep.mubr.f32.mxu1 %v683_v2 }
  0x17   : > { %620 = vmatmul.mubr.msk.f32.gmra.mxu0 %vm219_vm0, %v198_v7 }
  0x18   : > { %624 = vmatmul.mubr.msk.f32.gmra.mxu1 %vm219_vm0, %v202_v8  ;;  %326 = vmatprep.mubr.f32.mxu0 %v683_v2 }
  0x19   : > { %350 = vmatprep.mubr.f32.mxu1 %v683_v2 }
  0x1b   : > { %621 = vmatmul.mubr.msk.f32.gmra.mxu0 %vm219_vm0, %v199_v9 }
  0x1c   : > { %625 = vmatmul.mubr.msk.f32.gmra.mxu1 %vm219_vm0, %v203_v10  ;;  %v396_v10 = vld [vmem:[%s762_s29 + $0x30] sm:$0xff] }
  0xcf   : > { %v310_v16 = vpop.f32.mrf.mxu0 }
  0xd0   : > { %v334_v17 = vpop.f32.mrf.mxu1  ;;  %v311_v18 = vadd.f32 %v310_v16, %v212_v15 }
  0xd1   : > { %v335_v19 = vadd.f32 %v334_v17, %v212_v15  ;;  %v743_v20 = vpop.f32.mrf.mxu0 }
  0xd2   : > { %v745_v21 = vpop.f32.mrf.mxu1  ;;  %643 = vtanh.f32 %v311_v18  ;;  %v215_v18 = vsub.s32 1, %v734_v12 }
  0xd3   : > { %645 = vtanh.f32 %v335_v19  ;;  %v316_v22 = vpop.f32.mrf.mxu0 }
  0xd4   : > { %v340_v23 = vpop.f32.mrf.mxu1  ;;  %v317_v24 = vadd.f32 %v316_v22, %v212_v15  ;;  %v216_v19 = vrot.slane %v740_v14, %v215_v18  ;;  %v447_v22 = vld [vmem:[%s845_s2 + $0x11] ss:$0 sm:$0xff] }
  0xd5   : > { %v341_v25 = vadd.f32 %v340_v23, %v212_v15  ;;  %v747_v26 = vpop.f32.mrf.mxu0 }
  0xd6   : > { %v749_v27 = vpop.f32.mrf.mxu1  ;;  %647 = vtanh.f32 %v317_v24  ;;  %v313_v24 = vadd.f32 %v743_v20, %v216_v19  ;;  %v337_v14 = vadd.f32 %v745_v21, %v216_v19 }
  0xd7   : > { %649 = vtanh.f32 %v341_v25  ;;  %v322_v28 = vpop.f32.mrf.mxu0 }
  0xd8   : > { %v346_v29 = vpop.f32.mrf.mxu1  ;;  %v323_v30 = vadd.f32 %v322_v28, %v212_v15 }
  0xd9   : > { %v347_v31 = vadd.f32 %v346_v29, %v212_v15  ;;  %v751_v32 = vpop.f32.mrf.mxu0 }
  0xda   : > { %v753_v33 = vpop.f32.mrf.mxu1  ;;  %651 = vtanh.f32 %v323_v30 }
  0xdb   : > { %653 = vtanh.f32 %v347_v31  ;;  %v328_v34 = vpop.f32.mrf.mxu0 }
  0xdc   : > { %v352_v35 = vpop.f32.mrf.mxu1  ;;  %v329_v36 = vadd.f32 %v328_v34, %v212_v15 }
  0xdd   : > { %v353_v37 = vadd.f32 %v352_v35, %v212_v15  ;;  %v397_v15 = vld [vmem:[%s762_s29 + $0x38] sm:$0xff]  ;;  %v319_v35 = vadd.f32 %v747_v26, %v216_v19  ;;  %v325_v26 = vadd.f32 %v751_v32, %v216_v19 }
  0xde   : > { %655 = vtanh.f32 %v329_v36 }
  0xdf   : > { %v644_v39 = vpop.eup %643  ;;  %657 = vtanh.f32 %v353_v37 }
  0xe0   : > { %v646_v40 = vpop.eup %645  ;;  %v366_v41 = vmul.f32 %v644_v39, %v365_v38 }
  0xe1   : > { %v370_v42 = vmul.f32 %v646_v40, %v365_v38  ;;  %v343_v40 = vadd.f32 %v749_v27, %v216_v19  ;;  %v349_v27 = vadd.f32 %v753_v33, %v216_v19 }
  0xe2   : > { %374 = vadd.xlane.f32.xlu0 %v366_v41 }
  0xe3   : > { %v648_v43 = vpop.eup %647 }
  0xe4   : > { %v650_v44 = vpop.eup %649  ;;  %v367_v46 = vmul.f32 %v648_v43, %v365_v38  ;;  %v504_v43 = vld [vmem:[%s845_s2 + $0x13] ss:$0 sm:$0xff] }
  0xe5   : > { %v371_v45 = vmul.f32 %v650_v44, %v365_v38 }
  0xe6   : > { %382 = vadd.xlane.f32.xlu0 %v370_v42 }
  0xe7   : > { %v652_v47 = vpop.eup %651  ;;  %384 = vadd.xlane.f32.xlu1 %v371_v45 }
  0xe8   : > { %v654_v48 = vpop.eup %653  ;;  %v368_v49 = vmul.f32 %v652_v47, %v365_v38 }
  0xe9   : > { %v372_v50 = vmul.f32 %v654_v48, %v365_v38 }
  0xea   : > { %376 = vadd.xlane.f32.xlu0 %v367_v46 }
  0xeb   : > { %v656_v51 = vpop.eup %655  ;;  %378 = vadd.xlane.f32.xlu1 %v368_v49 }
  0xec   : > { %v658_v52 = vpop.eup %657  ;;  %v369_v53 = vmul.f32 %v656_v51, %v365_v38  ;;  %v330_v51 = vpop.f32.mrf.mxu0 }
  0xed   : > { %v373_v55 = vmul.f32 %v658_v52, %v365_v38 }
  0xee   : > { %386 = vadd.xlane.f32.xlu0 %v372_v50 }
  0xef   : > { %380 = vadd.xlane.f32.xlu1 %v369_v53 }
  0xf3   : > { %388 = vadd.xlane.f32.xlu1 %v373_v55  ;;  %v331_v55 = vadd.f32 %v330_v51, %v216_v19 }
 0x16b   : > { %v375_v57 = vpop.xlane.xlu0 %374 }
 0x16c   : > { %v398_v58 = vadd.f32 %v390_v56, %v375_v57  ;;  %v354_v57 = vpop.f32.mrf.mxu1 }
 0x16d   : > { %v355_v33 = vadd.f32 %v354_v57, %v216_v19 }
 0x16e   : > { %449 = vperm.xlu0 %641, %v398_v58  }
 0x16f   : > { %v383_v60 = vpop.xlane.xlu0 %382 }
 0x170   : > { %v402_v62 = vadd.f32 %v394_v59, %v383_v60  ;;  %v385_v63 = vpop.xlane.xlu1 %384 }
 0x171   : > { %v403_v1 = vadd.f32 %v395_v61, %v385_v63 }
 0x172   : > { %414 = vrot.lane.b32.xlu0 %v398_v58, %s685_s30  ;;  %465 = vperm.xlu1 %642, %v402_v62  }
 0x173   : > { %v377_v2 = vpop.xlane.xlu0 %376 }
 0x174   : > { %v399_v3 = vadd.f32 %v391_v0, %v377_v2  ;;  %v379_v4 = vpop.xlane.xlu1 %378 }
 0x175   : > { %v400_v9 = vadd.f32 %v392_v6, %v379_v4 }
 0x176   : > { %453 = vperm.xlu1 %642, %v399_v3   ;;  %424 = vrot.lane.b32.xlu0 %v403_v1, %s685_s30 }
 0x177   : > { %v387_v11 = vpop.xlane.xlu0 %386 }
 0x178   : > { %v381_v7 = vpop.xlane.xlu1 %380  ;;  %v774_v13 = vadd.f32 %v396_v10, %v387_v11 }
 0x179   : > { %v401_v8 = vadd.f32 %v393_v5, %v381_v7 }
 0x17a   : > { %469 = vperm.xlu1 %642, %v403_v1  }
 0x17b   : > { %420 = vrot.lane.b32.xlu0 %v401_v8, %s685_s30 }
 0x17c   : > { %v389_v16 = vpop.xlane.xlu1 %388 }
 0x17d   : > { %v778_v17 = vadd.f32 %v397_v15, %v389_v16 }
 0x17e   : > { %457 = vperm.xlu1 %642, %v400_v9  }
 0x182   : > { %473 = vperm.xlu1 %642, %v774_v13  }
 0x186   : > { %461 = vperm.xlu1 %642, %v401_v8  }
 0x18a   : > { %477 = vperm.xlu1 %642, %v778_v17  }
 0x18e   : > { %416 = vrot.lane.b32.xlu1 %v399_v3, %s685_s30 }
 0x192   : > { %418 = vrot.lane.b32.xlu1 %v400_v9, %s685_s30 }
 0x196   : > { %422 = vrot.lane.b32.xlu1 %v402_v62, %s685_s30 }
 0x1e9   : > { %v450_v23 = vpop.permute.xlu0 %449 }
 0x1ea   : > { %v480_v25 = vmul.f32 %v450_v23, %v447_v22 }
 0x1ec   : > { %v488_v28 = vadd.f32 %v480_v25, %v313_v24 }
 0x1ed   : > { %v466_v12 = vpop.permute.xlu1 %465  ;;  %v415_v29 = vpop.permute.xlu0 %414 }
 0x1ee   : > { %659 = vtanh.f32 %v488_v28  ;;  %v484_v30 = vmul.f32 %v466_v12, %v447_v22  ;;  %439 = vst.msk [vmem:[%s794_s8] sm:$0xff] %vm438_vm1, %v415_v29 }
 0x1f0   : > { %v492_v20 = vadd.f32 %v484_v30, %v337_v14 }
 0x1f1   : > { %v454_v31 = vpop.permute.xlu1 %453  ;;  %v425_v34 = vpop.permute.xlu0 %424 }
 0x1f2   : > { %661 = vtanh.f32 %v492_v20  ;;  %v481_v36 = vmul.f32 %v454_v31, %v447_v22  ;;  %444 = vst.msk [vmem:[%s794_s8 + $0x28] sm:$0xff] %vm438_vm1, %v425_v34 }
 0x1f4   : > { %v489_v37 = vadd.f32 %v481_v36, %v319_v35 }
 0x1f5   : > { %v470_v38 = vpop.permute.xlu1 %469  ;;  %v421_v39 = vpop.permute.xlu0 %420 }
 0x1f6   : > { %663 = vtanh.f32 %v489_v37  ;;  %v485_v21 = vmul.f32 %v470_v38, %v447_v22  ;;  %442 = vst.msk [vmem:[%s794_s8 + $0x18] sm:$0xff] %vm438_vm1, %v421_v39 }
 0x1f8   : > { %v493_v41 = vadd.f32 %v485_v21, %v343_v40 }
 0x1f9   : > { %v458_v42 = vpop.permute.xlu1 %457 }
 0x1fa   : > { %665 = vtanh.f32 %v493_v41  ;;  %v482_v44 = vmul.f32 %v458_v42, %v447_v22 }
 0x1fb   : > { %v660_v45 = vpop.eup %659 }
 0x1fc   : > { %v490_v46 = vadd.f32 %v482_v44, %v325_v26  ;;  %v505_v47 = vmul.f32 %v660_v45, %v504_v43 }
 0x1fd   : > { %v474_v48 = vpop.permute.xlu1 %473 }
 0x1fe   : > { %667 = vtanh.f32 %v490_v46  ;;  %v486_v49 = vmul.f32 %v474_v48, %v447_v22  ;;  %513 = vadd.xlane.f32.xlu1 %v505_v47 }
 0x1ff   : > { %v662_v50 = vpop.eup %661 }
 0x200   : > { %v494_v52 = vadd.f32 %v486_v49, %v349_v27  ;;  %v509_v53 = vmul.f32 %v662_v50, %v504_v43 }
 0x201   : > { %v462_v54 = vpop.permute.xlu1 %461 }
 0x202   : > { %669 = vtanh.f32 %v494_v52  ;;  %v483_v56 = vmul.f32 %v462_v54, %v447_v22  ;;  %521 = vadd.xlane.f32.xlu0 %v509_v53 }
 0x203   : > { %v664_v32 = vpop.eup %663 }
 0x204   : > { %v491_v58 = vadd.f32 %v483_v56, %v331_v55  ;;  %v506_v59 = vmul.f32 %v664_v32, %v504_v43 }
 0x205   : > { %v478_v60 = vpop.permute.xlu1 %477 }
 0x206   : > { %671 = vtanh.f32 %v491_v58  ;;  %v487_v61 = vmul.f32 %v478_v60, %v447_v22  ;;  %515 = vadd.xlane.f32.xlu0 %v506_v59 }
 0x207   : > { %v666_v62 = vpop.eup %665 }
 0x208   : > { %v495_v63 = vadd.f32 %v487_v61, %v355_v33  ;;  %v510_v0 = vmul.f32 %v666_v62, %v504_v43 }
 0x209   : > { %v417_v1 = vpop.permute.xlu1 %416 }
 0x20a   : > { %673 = vtanh.f32 %v495_v63  ;;  %440 = vst.msk [vmem:[%s794_s8 + $0x8] sm:$0xff] %vm438_vm1, %v417_v1  ;;  %523 = vadd.xlane.f32.xlu1 %v510_v0 }
 0x20b   : > { %v668_v2 = vpop.eup %667 }
 0x20c   : > { %v507_v3 = vmul.f32 %v668_v2, %v504_v43 }
 0x20d   : > { %v419_v4 = vpop.permute.xlu1 %418 }
 0x20e   : > { %441 = vst.msk [vmem:[%s794_s8 + $0x10] sm:$0xff] %vm438_vm1, %v419_v4  ;;  %517 = vadd.xlane.f32.xlu0 %v507_v3 }
 0x20f   : > { %v670_v5 = vpop.eup %669 }
 0x210   : > { %v511_v6 = vmul.f32 %v670_v5, %v504_v43 }
 0x211   : > { %v423_v7 = vpop.permute.xlu1 %422 }
 0x212   : > { %443 = vst.msk [vmem:[%s794_s8 + $0x20] sm:$0xff] %vm438_vm1, %v423_v7  ;;  %525 = vadd.xlane.f32.xlu0 %v511_v6 }
 0x213   : > { %v672_v8 = vpop.eup %671 }
 0x214   : > { %v508_v9 = vmul.f32 %v672_v8, %v504_v43 }
 0x216   : > { %519 = vadd.xlane.f32.xlu1 %v508_v9 }
 0x217   : > { %v674_v10 = vpop.eup %673 }
 0x218   : > { %v512_v11 = vmul.f32 %v674_v10, %v504_v43 }
 0x21a   : > { %527 = vadd.xlane.f32.xlu1 %v512_v11 }
 0x228   : > { %428 = vrot.lane.b32.xlu0 %v778_v17, %s685_s30 }
 0x22b   : > { %426 = vrot.lane.b32.xlu1 %v774_v13, %s685_s30 }
 0x287   : > { %v514_v15 = vpop.xlane.xlu1 %513 }
 0x288   : > { %530 = vst.msk [vmem:[%s794_s8] sm:$0xff] %vm529_vm2, %v514_v15 }
 0x28b   : > { %v522_v16 = vpop.xlane.xlu0 %521 }
 0x28c   : > { %534 = vst.msk [vmem:[%s794_s8 + $0x20] sm:$0xff] %vm529_vm2, %v522_v16 }
 0x28f   : > { %v516_v18 = vpop.xlane.xlu0 %515 }
 0x290   : > { %531 = vst.msk [vmem:[%s794_s8 + $0x8] sm:$0xff] %vm529_vm2, %v516_v18 }
 0x293   : > { %v524_v19 = vpop.xlane.xlu1 %523 }
 0x294   : > { %535 = vst.msk [vmem:[%s794_s8 + $0x28] sm:$0xff] %vm529_vm2, %v524_v19 }
 0x297   : > { %v518_v17 = vpop.xlane.xlu0 %517 }
 0x298   : > { %532 = vst.msk [vmem:[%s794_s8 + $0x10] sm:$0xff] %vm529_vm2, %v518_v17 }
 0x29b   : > { %v526_v13 = vpop.xlane.xlu0 %525 }
 0x29f   : > { %v520_v22 = vpop.xlane.xlu1 %519  ;;  %v429_v23 = vpop.permute.xlu0 %428 }
 0x2a0   : > { %533 = vst.msk [vmem:[%s794_s8 + $0x18] sm:$0xff] %vm529_vm2, %v520_v22 }
 0x2a1   : > { %446 = vst.msk [vmem:[%s794_s8 + $0x38] sm:$0xff] %vm438_vm1, %v429_v23 }
 0x2a3   : > { %v528_v24 = vpop.xlane.xlu1 %527 }
 0x2a4   : > { %537 = vst.msk [vmem:[%s794_s8 + $0x38] sm:$0xff] %vm529_vm2, %v528_v24 }
 0x2a7   : > { %v427_v25 = vpop.permute.xlu1 %426 }
 0x2a8   : > { %445 = vst.msk [vmem:[%s794_s8 + $0x30] sm:$0xff] %vm438_vm1, %v427_v25 }
 0x2a9   : > { %536 = vst.msk [vmem:[%s794_s8 + $0x30] sm:$0xff] %vm529_vm2, %v526_v13 }
 0x2aa PF: > { %s13_s12 = sadd.s32 1, %s681_s12  }
 0x2ab   : > { %p10_p4 = scmp.ge.s32.totalorder %s13_s12, 4  }
 0x2ad   :  { %12 = sbr.rel (!%p10_p4) target bundleno = 1 (0x1), region = 66 }

</bundles_post_ra>
